<compile_context>
chip_gen: v7x
topology: tpu7x:2x2x1
jax: 0.10.0
libtpu: 0.0.40
codegen_flags: <defaults>
</compile_context>

<pallas_src>
import functools

import jax
import jax.numpy as jnp
import numpy as np
from jax.experimental import pallas as pl
from jax.experimental.pallas import tpu as pltpu


def _round_up(x, m):
    return ((x + m - 1) // m) * m


# ---------------------------------------------------------------------------
# Fused kernel: in-VMEM patch gather + projection matmul (no HBM im2col pass).
# ---------------------------------------------------------------------------
def _fused_kernel(x_ref, w_ref, b_ref, o_ref, *, C, bh, ph, gw, pw, compute_dtype):
    # x_ref: (1, C, bh*ph, gw*pw)  raw NCHW slab covering `bh` rows of patches
    # w_ref: (K, E)                VMEM-resident weight, K flattened (c, i, j)
    # b_ref: (1, E)                VMEM-resident bias (f32)
    # o_ref: (1, bh*gw, E)         output rows for this slab
    K = C * ph * pw
    xb = x_ref[...].reshape(C, bh, ph, gw, pw)
    xb = jnp.transpose(xb, (1, 3, 0, 2, 4))           # (bh, gw, C, ph, pw)
    patches = xb.reshape(bh * gw, K).astype(compute_dtype)
    acc = jnp.dot(patches, w_ref[...], preferred_element_type=jnp.float32)
    acc = acc + b_ref[...]
    o_ref[0] = acc.astype(o_ref.dtype)


def _pick_row_block(gh, gw, ph, target_rows):
    # Smallest divisor bh of gh that (a) keeps the (8, 128) block rule happy
    # ((bh*ph) % 8 == 0 and (bh*gw) % 8 == 0) and (b) yields >= target_rows
    # matmul rows per grid step (amortizes the ~0.35us/step overhead).
    # Otherwise take the whole image per step (always legal: full dims).
    for d in range(1, gh):
        if gh % d:
            continue
        if (d * ph) % 8 or (d * gw) % 8:
            continue
        if d * gw >= target_rows:
            return d
    return gh


def _patch_embed_fused(x, w2d, b2d, *, patch_size, compute_dtype, out_dtype,
                       single_buffer_params, vmem_limit_bytes, target_rows=256):
    B, C, H, W = x.shape
    ph = pw = patch_size
    gh, gw = H // ph, W // pw
    P = gh * gw
    K, E = w2d.shape

    bh = _pick_row_block(gh, gw, ph, target_rows)
    grid = (B, gh // bh)

    kernel = functools.partial(_fused_kernel, C=C, bh=bh, ph=ph, gw=gw, pw=pw,
                               compute_dtype=compute_dtype)

    const_kw = {}
    if single_buffer_params:
        # Grid-invariant blocks: single-buffer to free VMEM for bigger slabs.
        const_kw = dict(pipeline_mode=pl.Buffered(1))

    in_specs = [
        pl.BlockSpec((1, C, bh * ph, W), lambda b, r: (b, 0, r, 0)),  # raw NCHW slab
        pl.BlockSpec((K, E), lambda b, r: (0, 0), **const_kw),        # resident weight
        pl.BlockSpec((1, E), lambda b, r: (0, 0), **const_kw),        # resident bias
    ]
    out_specs = pl.BlockSpec((1, bh * gw, E), lambda b, r: (b, r, 0))

    cost = pl.CostEstimate(
        flops=2 * B * P * K * E,
        transcendentals=0,
        bytes_accessed=B * C * H * W * x.dtype.itemsize
        + K * E * jnp.dtype(compute_dtype).itemsize
        + E * 4
        + B * P * E * jnp.dtype(out_dtype).itemsize,
    )

    cp_kwargs = dict(dimension_semantics=("parallel", "parallel"))
    if vmem_limit_bytes is not None:
        cp_kwargs["vmem_limit_bytes"] = int(vmem_limit_bytes)

    return pl.pallas_call(
        kernel,
        out_shape=jax.ShapeDtypeStruct((B, P, E), out_dtype),
        grid_spec=pltpu.PrefetchScalarGridSpec(
            num_scalar_prefetch=0,
            grid=grid,
            in_specs=in_specs,
            out_specs=out_specs,
        ),
        compiler_params=pltpu.CompilerParams(**cp_kwargs),
        cost_estimate=cost,
    )(x, w2d, b2d)


# ---------------------------------------------------------------------------
# Unfused fallback: wrapper-side im2col + plain tiled matmul (proven path).
# ---------------------------------------------------------------------------
def _unfused_kernel(x_ref, w_ref, b_ref, o_ref):
    acc = jnp.dot(x_ref[...], w_ref[...], preferred_element_type=jnp.float32)
    acc = acc + b_ref[...]
    o_ref[...] = acc.astype(o_ref.dtype)


def _patch_embed_unfused(x, w2d, b2d, *, patch_size, compute_dtype, out_dtype,
                         block_m, vmem_limit_bytes):
    B, C, H, W = x.shape
    ph = pw = patch_size
    gh, gw = H // ph, W // pw
    P = gh * gw
    K, E = w2d.shape
    M = B * P

    # Wrapper-side im2col (extra HBM pass; the fused path avoids this).
    xc = x.astype(compute_dtype)
    patches = xc.reshape(B, C, gh, ph, gw, pw)
    patches = jnp.transpose(patches, (0, 2, 4, 1, 3, 5)).reshape(M, K)

    # M tiling.  For M > 512 force grid_m >= 2 so the "parallel" axis can be
    # split across both v7x TensorCores.  A ragged last tile is computed on
    # padded garbage rows and masked by Pallas on writeback (correct).
    if M > 512:
        tm = min(block_m, _round_up((M + 1) // 2, 256))
    else:
        tm = M
    grid_m = pl.cdiv(M, tm)

    in_bytes = jnp.dtype(compute_dtype).itemsize
    cost = pl.CostEstimate(
        flops=2 * M * K * E,
        transcendentals=0,
        bytes_accessed=(M * K + K * E) * in_bytes + E * 4
        + M * E * jnp.dtype(out_dtype).itemsize,
    )

    cp_kwargs = dict(dimension_semantics=("parallel",))
    if vmem_limit_bytes is not None:
        cp_kwargs["vmem_limit_bytes"] = int(vmem_limit_bytes)

    out = pl.pallas_call(
        _unfused_kernel,
        out_shape=jax.ShapeDtypeStruct((M, E), out_dtype),
        grid_spec=pltpu.PrefetchScalarGridSpec(
            num_scalar_prefetch=0,
            grid=(grid_m,),
            in_specs=[
                pl.BlockSpec((tm, K), lambda i: (i, 0)),   # streamed over M
                pl.BlockSpec((K, E), lambda i: (0, 0)),    # resident weight
                pl.BlockSpec((1, E), lambda i: (0, 0)),    # resident bias
            ],
            out_specs=pl.BlockSpec((tm, E), lambda i: (i, 0)),
        ),
        compiler_params=pltpu.CompilerParams(**cp_kwargs),
        cost_estimate=cost,
    )(patches, w2d, b2d)
    return out.reshape(B, P, E)


# ---------------------------------------------------------------------------
# Public wrapper (same semantics as the PyTorch PatchEmbed.forward).
# ---------------------------------------------------------------------------
def patch_embed(x, weight, bias, patch_size, *, compute_dtype=jnp.bfloat16,
                out_dtype=None, fuse=True, single_buffer_params=True,
                block_m=1024, vmem_limit_bytes=64 * 1024 * 1024):
    """
    x:      (B, C, H, W)    NCHW, like torch
    weight: (E, C, ph, pw)  torch Conv2d weight layout
    bias:   (E,)
    returns (B, num_patches, E)

    compute_dtype: dtype fed to the MXU (accumulation is always f32).  bf16 is
                   the fast/full-rate path on all generations (v7x MXU has no
                   int dense path).  Note: even compute_dtype=f32 uses default
                   TPU matmul precision (multi-pass bf16), ~2e-3 of true f32.
    out_dtype:     defaults to x.dtype for module parity; pass jnp.bfloat16 to
                   halve the dominant HBM write on mem-bound v6e.
    fuse:          gather patches inside the kernel (no HBM im2col pass).
    """
    B, C, H, W = x.shape
    E = weight.shape[0]
    ph = pw = patch_size
    assert H % ph == 0 and W % pw == 0, "image size must be divisible by patch"
    K = C * ph * pw
    if compute_dtype is None:
        compute_dtype = x.dtype
    if out_dtype is None:
        out_dtype = x.dtype

    # (E, C, ph, pw) -> (K, E) with K flattened in (c, i, j) order (Conv2d order).
    w2d = weight.reshape(E, K).T.astype(compute_dtype)
    b2d = bias.reshape(1, E).astype(jnp.float32)
    # TODO(synk): zero-pad K / E to the MXU tile (256 on v6e/v7x, 128 on v5e)
    # for ragged shapes such as patch-14 (K=588) and slice the output back.

    if fuse:
        return _patch_embed_fused(
            x, w2d, b2d, patch_size=patch_size, compute_dtype=compute_dtype,
            out_dtype=out_dtype, single_buffer_params=single_buffer_params,
            vmem_limit_bytes=vmem_limit_bytes)
    return _patch_embed_unfused(
        x, w2d, b2d, patch_size=patch_size, compute_dtype=compute_dtype,
        out_dtype=out_dtype, block_m=block_m, vmem_limit_bytes=vmem_limit_bytes)


if __name__ == "__main__":
    # Small, self-consistent shapes: image 16x16, patch 4, 4 channels, embed 32.
    B, C, H, W = 2, 4, 16, 16
    patch_size = 4
    embed_dim = 32
    gh, gw = H // patch_size, W // patch_size

    key = jax.random.PRNGKey(0)
    kx, kw, kb = jax.random.split(key, 3)
    x = jax.random.normal(kx, (B, C, H, W), dtype=jnp.float32)
    weight = jax.random.normal(kw, (embed_dim, C, patch_size, patch_size),
                               dtype=jnp.float32) * 0.02
    bias = jax.random.normal(kb, (embed_dim,), dtype=jnp.float32) * 0.02

    # Pure-JAX f32 reference (== Conv2d(stride=patch) + flatten(2) + transpose).
    def reference(x, weight, bias):
        p = x.reshape(B, C, gh, patch_size, gw, patch_size)
        p = jnp.transpose(p, (0, 2, 4, 1, 3, 5)).reshape(B, gh * gw, -1)
        wT = weight.reshape(embed_dim, -1).T
        return jnp.dot(p, wT, precision=jax.lax.Precision.HIGHEST) + bias

    ref = np.asarray(reference(x, weight, bias))

    def run_and_check(**kw):
        out_f32 = patch_embed(x, weight, bias, patch_size,
                              compute_dtype=jnp.float32, **kw)
        jax.block_until_ready(out_f32)
        out_bf16 = patch_embed(x, weight, bias, patch_size, **kw)
        jax.block_until_ready(out_bf16)
        assert out_f32.shape == (B, gh * gw, embed_dim), out_f32.shape
        assert out_bf16.shape == (B, gh * gw, embed_dim), out_bf16.shape
        np.testing.assert_allclose(np.asarray(out_f32), ref, rtol=2e-3, atol=2e-3)
        np.testing.assert_allclose(np.asarray(out_bf16), ref, rtol=5e-2, atol=5e-2)

    # Prefer the fused (in-kernel gather) kernel; fall back if this Mosaic
    # version cannot lower / mis-lowers the in-VMEM relayout or Buffered(1).
    attempts = (
        dict(),                                             # fused + Buffered(1)
        dict(single_buffer_params=False),                   # fused, default bufs
        dict(fuse=False, single_buffer_params=False,        # proven fallback
             vmem_limit_bytes=None),
    )
    last_err = None
    for kwargs in attempts:
        try:
            run_and_check(**kwargs)
            last_err = None
            break
        except Exception as e:  # deliberate broad fallback to keep the run clean
            last_err = e
    if last_err is not None:
        raise last_err

    print("KERNEL_OK")
</pallas_src>

<mosaic_0001>
module attributes {stable_mosaic.version = 11 : i64} {
  func.func @_fused_kernel(%arg0: i32, %arg1: i32, %arg2: memref<1x4x16x16xf32, #tpu.memory_space<vmem>>, %arg3: memref<64x32xf32, #tpu.memory_space<vmem>>, %arg4: memref<1x32xf32, #tpu.memory_space<vmem>>, %arg5: memref<1x16x32xf32, #tpu.memory_space<vmem>>) attributes {dimension_semantics = [#tpu.dimension_semantics<parallel>, #tpu.dimension_semantics<parallel>], iteration_bounds = array<i64: 2, 1>, scalar_prefetch = 0 : i64, scratch_operands = 0 : i64, tpu.core_type = #tpu.core_type<tc>, window_params = [{transform_indices = @transform_0, window_bounds = array<i64: 1, 4, 16, 16>}, {pipeline_mode = #tpu.pipeline_mode<synchronous>, transform_indices = @transform_1, window_bounds = array<i64: 64, 32>}, {pipeline_mode = #tpu.pipeline_mode<synchronous>, transform_indices = @transform_2, window_bounds = array<i64: 1, 32>}, {transform_indices = @transform_3, window_bounds = array<i64: 1, 16, 32>}]} {
    %c0 = arith.constant 0 : index
    %c0_0 = arith.constant 0 : index
    %c0_1 = arith.constant 0 : index
    %c0_2 = arith.constant 0 : index
    %0 = vector.load %arg2[%c0, %c0_0, %c0_1, %c0_2] : memref<1x4x16x16xf32, #tpu.memory_space<vmem>>, vector<1x4x16x16xf32>
    %1 = vector.shape_cast %0 : vector<1x4x16x16xf32> to vector<4x4x4x4x4xf32>
    %2 = tpu.transpose %1, [1, 3, 0, 2, 4] : vector<4x4x4x4x4xf32> -> vector<4x4x4x4x4xf32>
    %3 = vector.shape_cast %2 : vector<4x4x4x4x4xf32> to vector<16x64xf32>
    %c0_3 = arith.constant 0 : index
    %c0_4 = arith.constant 0 : index
    %4 = vector.load %arg3[%c0_3, %c0_4] : memref<64x32xf32, #tpu.memory_space<vmem>>, vector<64x32xf32>
    %cst = arith.constant dense<0.000000e+00> : vector<16x32xf32>
    %5 = tpu.matmul %3, %4, %cst {dimension_numbers = #tpu.dot_dimension_numbers<[1], [0], [0], [1], [0, 0, 1, 1], [], []>} : vector<16x64xf32>, vector<64x32xf32>, vector<16x32xf32> -> vector<16x32xf32>
    %c0_5 = arith.constant 0 : index
    %c0_6 = arith.constant 0 : index
    %6 = vector.load %arg4[%c0_5, %c0_6] : memref<1x32xf32, #tpu.memory_space<vmem>>, vector<1x32xf32>
    %7 = vector.broadcast %6 : vector<1x32xf32> to vector<16x32xf32>
    %8 = arith.addf %5, %7 : vector<16x32xf32>
    %c0_7 = arith.constant 0 : index
    %c0_8 = arith.constant 0 : index
    %c0_9 = arith.constant 0 : index
    %9 = vector.load %arg5[%c0_7, %c0_8, %c0_9] : memref<1x16x32xf32, #tpu.memory_space<vmem>>, vector<1x16x32xf32>
    %10 = vector.shape_cast %9 : vector<1x16x32xf32> to vector<16x32xf32>
    %11 = vector.shape_cast %8 : vector<16x32xf32> to vector<1x16x32xf32>
    tpu.vector_store %arg5[%c0_7, %c0_8, %c0_9], %11 {strides = array<i32>} : memref<1x16x32xf32, #tpu.memory_space<vmem>>, vector<1x16x32xf32>,
    return
  }
  func.func @transform_0(%arg0: i32, %arg1: i32) -> (i32, i32, i32, i32) {
    %c0_i32 = arith.constant 0 : i32
    %c0_i32_0 = arith.constant 0 : i32
    %c0_i32_1 = arith.constant 0 : i32
    return %arg0, %c0_i32, %arg1, %c0_i32_0 : i32, i32, i32, i32
  }
  func.func @transform_1(%arg0: i32, %arg1: i32) -> (i32, i32) {
    %c0_i32 = arith.constant 0 : i32
    %c0_i32_0 = arith.constant 0 : i32
    %c0_i32_1 = arith.constant 0 : i32
    return %c0_i32, %c0_i32_0 : i32, i32
  }
  func.func @transform_2(%arg0: i32, %arg1: i32) -> (i32, i32) {
    %c0_i32 = arith.constant 0 : i32
    %c0_i32_0 = arith.constant 0 : i32
    %c0_i32_1 = arith.constant 0 : i32
    return %c0_i32, %c0_i32_0 : i32, i32
  }
  func.func @transform_3(%arg0: i32, %arg1: i32) -> (i32, i32, i32) {
    %c0_i32 = arith.constant 0 : i32
    %c0_i32_0 = arith.constant 0 : i32
    return %arg0, %arg1, %c0_i32 : i32, i32, i32
  }
}

module attributes {stable_mosaic.version = 11 : i64} {
  func.func @_fused_kernel(%arg0: i32, %arg1: i32, %arg2: memref<1x4x16x16xf32, #tpu.memory_space<vmem>>, %arg3: memref<64x32xf32, #tpu.memory_space<vmem>>, %arg4: memref<1x32xf32, #tpu.memory_space<vmem>>, %arg5: memref<1x16x32xf32, #tpu.memory_space<vmem>>) attributes {dimension_semantics = [#tpu.dimension_semantics<parallel>, #tpu.dimension_semantics<parallel>], iteration_bounds = array<i64: 2, 1>, scalar_prefetch = 0 : i64, scratch_operands = 0 : i64, tpu.core_type = #tpu.core_type<tc>, window_params = [{transform_indices = @transform_0, window_bounds = array<i64: 1, 4, 16, 16>}, {pipeline_mode = #tpu.pipeline_mode<synchronous>, transform_indices = @transform_1, window_bounds = array<i64: 64, 32>}, {pipeline_mode = #tpu.pipeline_mode<synchronous>, transform_indices = @transform_2, window_bounds = array<i64: 1, 32>}, {transform_indices = @transform_3, window_bounds = array<i64: 1, 16, 32>}]} {
    %c0 = arith.constant 0 : index
    %c0_0 = arith.constant 0 : index
    %c0_1 = arith.constant 0 : index
    %c0_2 = arith.constant 0 : index
    %0 = vector.load %arg2[%c0, %c0_0, %c0_1, %c0_2] : memref<1x4x16x16xf32, #tpu.memory_space<vmem>>, vector<1x4x16x16xf32>
    %1 = vector.shape_cast %0 : vector<1x4x16x16xf32> to vector<4x4x4x4x4xf32>
    %2 = tpu.transpose %1, [1, 3, 0, 2, 4] : vector<4x4x4x4x4xf32> -> vector<4x4x4x4x4xf32>
    %3 = vector.shape_cast %2 : vector<4x4x4x4x4xf32> to vector<16x64xf32>
    %c0_3 = arith.constant 0 : index
    %c0_4 = arith.constant 0 : index
    %4 = vector.load %arg3[%c0_3, %c0_4] : memref<64x32xf32, #tpu.memory_space<vmem>>, vector<64x32xf32>
    %cst = arith.constant dense<0.000000e+00> : vector<16x32xf32>
    %5 = tpu.matmul %3, %4, %cst {dimension_numbers = #tpu.dot_dimension_numbers<[1], [0], [0], [1], [0, 0, 1, 1], [], []>} : vector<16x64xf32>, vector<64x32xf32>, vector<16x32xf32> -> vector<16x32xf32>
    %c0_5 = arith.constant 0 : index
    %c0_6 = arith.constant 0 : index
    %6 = vector.load %arg4[%c0_5, %c0_6] : memref<1x32xf32, #tpu.memory_space<vmem>>, vector<1x32xf32>
    %7 = vector.broadcast %6 : vector<1x32xf32> to vector<16x32xf32>
    %8 = arith.addf %5, %7 : vector<16x32xf32>
    %c0_7 = arith.constant 0 : index
    %c0_8 = arith.constant 0 : index
    %c0_9 = arith.constant 0 : index
    %9 = vector.load %arg5[%c0_7, %c0_8, %c0_9] : memref<1x16x32xf32, #tpu.memory_space<vmem>>, vector<1x16x32xf32>
    %10 = vector.shape_cast %9 : vector<1x16x32xf32> to vector<16x32xf32>
    %11 = vector.shape_cast %8 : vector<16x32xf32> to vector<1x16x32xf32>
    tpu.vector_store %arg5[%c0_7, %c0_8, %c0_9], %11 {strides = array<i32>} : memref<1x16x32xf32, #tpu.memory_space<vmem>>, vector<1x16x32xf32>,
    return
  }
  func.func @transform_0(%arg0: i32, %arg1: i32) -> (i32, i32, i32, i32) {
    %c0_i32 = arith.constant 0 : i32
    %c0_i32_0 = arith.constant 0 : i32
    %c0_i32_1 = arith.constant 0 : i32
    return %arg0, %c0_i32, %arg1, %c0_i32_0 : i32, i32, i32, i32
  }
  func.func @transform_1(%arg0: i32, %arg1: i32) -> (i32, i32) {
    %c0_i32 = arith.constant 0 : i32
    %c0_i32_0 = arith.constant 0 : i32
    %c0_i32_1 = arith.constant 0 : i32
    return %c0_i32, %c0_i32_0 : i32, i32
  }
  func.func @transform_2(%arg0: i32, %arg1: i32) -> (i32, i32) {
    %c0_i32 = arith.constant 0 : i32
    %c0_i32_0 = arith.constant 0 : i32
    %c0_i32_1 = arith.constant 0 : i32
    return %c0_i32, %c0_i32_0 : i32, i32
  }
  func.func @transform_3(%arg0: i32, %arg1: i32) -> (i32, i32, i32) {
    %c0_i32 = arith.constant 0 : i32
    %c0_i32_0 = arith.constant 0 : i32
    return %arg0, %arg1, %c0_i32 : i32, i32, i32
  }
}

module attributes {stable_mosaic.version = 11 : i64} {
  func.func @_unfused_kernel(%arg0: i32, %arg1: memref<32x64xf32, #tpu.memory_space<vmem>>, %arg2: memref<64x32xf32, #tpu.memory_space<vmem>>, %arg3: memref<1x32xf32, #tpu.memory_space<vmem>>, %arg4: memref<32x32xf32, #tpu.memory_space<vmem>>) attributes {dimension_semantics = [#tpu.dimension_semantics<parallel>], iteration_bounds = array<i64: 1>, scalar_prefetch = 0 : i64, scratch_operands = 0 : i64, tpu.core_type = #tpu.core_type<tc>, window_params = [{transform_indices = @transform_0, window_bounds = array<i64: 32, 64>}, {pipeline_mode = #tpu.pipeline_mode<synchronous>, transform_indices = @transform_1, window_bounds = array<i64: 64, 32>}, {pipeline_mode = #tpu.pipeline_mode<synchronous>, transform_indices = @transform_2, window_bounds = array<i64: 1, 32>}, {transform_indices = @transform_3, window_bounds = array<i64: 32, 32>}]} {
    %c0 = arith.constant 0 : index
    %c0_0 = arith.constant 0 : index
    %0 = vector.load %arg1[%c0, %c0_0] : memref<32x64xf32, #tpu.memory_space<vmem>>, vector<32x64xf32>
    %c0_1 = arith.constant 0 : index
    %c0_2 = arith.constant 0 : index
    %1 = vector.load %arg2[%c0_1, %c0_2] : memref<64x32xf32, #tpu.memory_space<vmem>>, vector<64x32xf32>
    %cst = arith.constant dense<0.000000e+00> : vector<32x32xf32>
    %2 = tpu.matmul %0, %1, %cst {dimension_numbers = #tpu.dot_dimension_numbers<[1], [0], [0], [1], [0, 0, 1, 1], [], []>} : vector<32x64xf32>, vector<64x32xf32>, vector<32x32xf32> -> vector<32x32xf32>
    %c0_3 = arith.constant 0 : index
    %c0_4 = arith.constant 0 : index
    %3 = vector.load %arg3[%c0_3, %c0_4] : memref<1x32xf32, #tpu.memory_space<vmem>>, vector<1x32xf32>
    %4 = vector.broadcast %3 : vector<1x32xf32> to vector<32x32xf32>
    %5 = arith.addf %2, %4 : vector<32x32xf32>
    %c0_5 = arith.constant 0 : index
    %c0_6 = arith.constant 0 : index
    %6 = vector.load %arg4[%c0_5, %c0_6] : memref<32x32xf32, #tpu.memory_space<vmem>>, vector<32x32xf32>
    tpu.vector_store %arg4[%c0_5, %c0_6], %5 {strides = array<i32>} : memref<32x32xf32, #tpu.memory_space<vmem>>, vector<32x32xf32>,
    return
  }
  func.func @transform_0(%arg0: i32) -> (i32, i32) {
    %c0_i32 = arith.constant 0 : i32
    %c0_i32_0 = arith.constant 0 : i32
    return %arg0, %c0_i32 : i32, i32
  }
  func.func @transform_1(%arg0: i32) -> (i32, i32) {
    %c0_i32 = arith.constant 0 : i32
    %c0_i32_0 = arith.constant 0 : i32
    %c0_i32_1 = arith.constant 0 : i32
    return %c0_i32, %c0_i32_0 : i32, i32
  }
  func.func @transform_2(%arg0: i32) -> (i32, i32) {
    %c0_i32 = arith.constant 0 : i32
    %c0_i32_0 = arith.constant 0 : i32
    %c0_i32_1 = arith.constant 0 : i32
    return %c0_i32, %c0_i32_0 : i32, i32
  }
  func.func @transform_3(%arg0: i32) -> (i32, i32) {
    %c0_i32 = arith.constant 0 : i32
    %c0_i32_0 = arith.constant 0 : i32
    return %arg0, %c0_i32 : i32, i32
  }
}

</mosaic_0001>

<bundles_post_ra>
// kernel: tpu_custom_call.1
= control target key start
LH: loop header
LB: loop body
LE: loop exit
PB: predicated region body
PF: predicated region fallthrough
CT: control target
= control target key end

     0   :  { %vm34_vm0 = vcmask 523264   ;;  %s321_s0 = inlined_call_operand.vmem [shape: f32[32,64], index: 0, kind: input, shape index: {}]   ;;  %s322_s1 = inlined_call_operand.vmem [shape: f32[64,32], index: 1, kind: input, shape index: {}]   ;;  %s323_s2 = inlined_call_operand.vmem [shape: f32[1,32], index: 2, kind: input, shape index: {}]   ;;  %s324_s3 = inlined_call_operand.hbm [shape: f32[32,32], index: 3, kind: output, shape index: {}]  }
   0x1   :  { %v19_v0 = vld [vmem:[%s322_s1] sm:$0xff]  ;;  %v20_v1 = vld [vmem:[%s322_s1 + $0x8] sm:$0xff]  ;;  %v21_v2 = vld [vmem:[%s322_s1 + $0x10] sm:$0xff] }
   0x2   :  { %v192_v3 = vpack.c.bf16 %v20_v1, %v19_v0  ;;  %v22_v4 = vld [vmem:[%s322_s1 + $0x18] sm:$0xff]  ;;  %v23_v6 = vld [vmem:[%s322_s1 + $0x20] sm:$0xff]  ;;  %v24_v7 = vld [vmem:[%s322_s1 + $0x28] sm:$0xff] }
   0x3   :  { %v196_v5 = vpack.c.bf16 %v22_v4, %v21_v2  ;;  %v15_v8 = vld [vmem:[%s321_s0] sm:$0xff]  ;;  %v17_v9 = vld [vmem:[%s321_s0 + $0x10] sm:$0xff] }
   0x4   :  { %193 = vmatprep.subr.bf16.mxu0 %v192_v3  ;;  %208 = vmatprep.subr.bf16.mxu1 %v192_v3 }
   0x5   :  { %195 = vmatpush3.bf16.msra.mxu0 %v192_v3  ;;  %212 = vmatpush3.bf16.msra.mxu1 %v192_v3 }
   0x6   :  { %8 = vsyncpa [#allocation3], 0  ;;  %197 = vmatprep.subr.bf16.mxu0 %v196_v5  ;;  %209 = vmatprep.subr.bf16.mxu1 %v196_v5  ;;  %v200_v10 = vpack.c.bf16 %v24_v7, %v23_v6  ;;  %v25_v11 = vld [vmem:[%s322_s1 + $0x30] sm:$0xff]  ;;  %v26_v12 = vld [vmem:[%s322_s1 + $0x38] sm:$0xff]  ;;  %s243_s10 = smov [#allocation2]   ;;  %vm132_vm1 = vcmask 261120  }
   0x7   :  { %186 = vmatprep.mubr.msk.f32.mxu0 %vm34_vm0, %v15_v8  ;;  %189 = vmatprep.mubr.msk.f32.mxu1 %vm34_vm0, %v17_v9  ;;  %v204_v13 = vpack.c.bf16 %v26_v12, %v25_v11  ;;  %v16_v14 = vld [vmem:[%s321_s0 + $0x8] sm:$0xff]  ;;  %v18_v15 = vld [vmem:[%s321_s0 + $0x18] sm:$0xff]  ;;  %v153_v16 = vld [vmem:[%s323_s2] ss:$0 sm:$0xff]  ;;  %s142_s11 = sshll.u32 %s243_s10, 4  ;;  %s143_s11 = int_to_ptr.vmem [resolvable:$true] %s142_s11 }
   0x8   :  { %s219_s0 = scalar_lea.vmem %s143_s11, 512  ;;  %p224_p1 = scmp.lt.s32.totalorder %s143_s11, %s143_s11 }
   0x9   :  { %199 = vmatpush3.bf16.msra.mxu0 %v196_v5  ;;  %213 = vmatpush3.bf16.msra.mxu1 %v196_v5  ;;  %p220_p0 = scmp.ne.s32.totalorder %s143_s11, %s219_s0  ;;  %p225_p2 = scmp.lt.s32.totalorder %s219_s0, %s219_s0 }
   0xa   :  { %201 = vmatprep.subr.bf16.mxu0 %v200_v10  ;;  %210 = vmatprep.subr.bf16.mxu1 %v200_v10 }
   0xb   :  { %p226_p3 = por %p225_p2, %p224_p1 }
   0xd   :  { %203 = vmatpush3.bf16.msra.mxu0 %v200_v10  ;;  %214 = vmatpush3.bf16.msra.mxu1 %v200_v10  ;;  %p227_p4 = pnand %p226_p3, %p220_p0 }
   0xe   :  { %205 = vmatprep.subr.bf16.mxu0 %v204_v13  ;;  %211 = vmatprep.subr.bf16.mxu1 %v204_v13 }
  0x11   :  { %207 = vmatpush3.bf16.msra.mxu0 %v204_v13  ;;  %215 = vmatpush3.bf16.msra.mxu1 %v204_v13 }
  0x14   :  { %187 = vmatmul.mubr.msk.f32.vlgmr.msra.gmra.mrb[0].mxu0 %vm34_vm0, %v16_v14  ;;  %190 = vmatmul.mubr.msk.f32.vlgmr.msra.gmra.mrb[0].mxu1 %vm34_vm0, %v18_v15 }
  0xe7   :  { %v188_v17 = vpop.f32.mrb[0].mxu0  ;;  %v191_v18 = vpop.f32.mrb[0].mxu1 }
  0xe8   :  { %v119_v19 = vadd.f32 %v188_v17, %v153_v16  ;;  %v129_v20 = vadd.f32 %v191_v18, %v153_v16  ;;  %v113_v21 = vpop.f32.mrb[1].mxu0  ;;  %v123_v22 = vpop.f32.mrb[1].mxu1 }
  0xe9   :  { %v114_v23 = vadd.f32 %v153_v16, %v113_v21  ;;  %v124_v24 = vadd.f32 %v153_v16, %v123_v22 }
  0xea   :  { %134 = vst.msk [vmem:[#allocation2 + $0x8] sm:$0xff] %vm132_vm1, %v119_v19  ;;  %136 = vst.msk [vmem:[#allocation2 + $0x18] sm:$0xff] %vm132_vm1, %v129_v20 }
  0xeb   :  { %133 = vst.msk [vmem:[#allocation2] sm:$0xff] %vm132_vm1, %v114_v23  ;;  %135 = vst.msk [vmem:[#allocation2 + $0x10] sm:$0xff] %vm132_vm1, %v124_v24 }
  0xec   :  { %230 = shalt.err (!%p227_p4)
}
  0xed   :  { %s231_s13 = scalar_lea.hbm %s324_s3, 512 }
  0xee   :  { %p232_p5 = scmp.ne.s32.totalorder %s324_s3, %s231_s13  ;;  %p235_p6 = scmp.lt.u32.totalorder %s231_s13, %s324_s3 }
  0xf0   :  { %p237_p7 = pnand %p235_p6, %p232_p5 }
  0xf2   :  { %240 = shalt.err (!%p237_p7)
}
  0xf3   :  { %s244_s18 = smov 128   ;;  %s245_s19 = smov 8  }
  0xf4   :  { %148 = dma.vmem_to_hbm [thread:$0]  %s143_s11, 512, %s324_s3, [#allocation3], %s244_s18, %s244_s18, %s245_s19  }
  0xf5   :  { %241 = dma.done.wait [#allocation3], 512  }
  0xf6   :  { %242 = vsyncadd [#allocation3], 4294966784 }
  0xf7   :  { %152 = vsyncpa [#allocation3], 1 }

</bundles_post_ra>
